<compile_context>
chip_gen: v7x
topology: tpu7x:2x2x1
jax: 0.10.0
libtpu: 0.0.40
codegen_flags: <defaults>
</compile_context>

<pallas_src>
import functools

import jax
import jax.numpy as jnp
from jax.experimental import pallas as pl
from jax.experimental.pallas import tpu as pltpu


CONFIG_FLOW = {
    'boundaries': (250000,),
    'values': (0.0, 0.01),
    'scale': 2,
    'enabled': False,
}


def _flow_loss_kernel(boundaries, values, it_ref, a_ref, b_ref, o_ref):
    """out = schedule(iteration) * mean(|a - b|, axis=channel).

    boundaries / values are compile-time Python constants (baked via
    functools.partial); `iteration` arrives as an int32 scalar in SMEM, so the
    whole schedule is a handful of scalar-unit compares/selects.
    """
    it = it_ref[0]                                   # int32 scalar (SMEM)
    w = jnp.float32(values[-1])                      # fallback: values[-1]
    # Reverse-order select chain == first-match semantics of the PyTorch loop
    # (correct even for unsorted boundaries).
    for bd, val in reversed(list(zip(boundaries, values))):
        if float(bd).is_integer() and -2**31 <= int(bd) < 2**31:
            cond = it < jnp.int32(int(bd))           # exact integer compare
        else:
            cond = it.astype(jnp.float32) < jnp.float32(float(bd))
        w = jnp.where(cond, jnp.float32(val), w)

    d = jnp.abs(a_ref[...].astype(jnp.float32) - b_ref[...].astype(jnp.float32))
    o_ref[...] = (w * jnp.mean(d, axis=1, keepdims=True)).astype(o_ref.dtype)


@functools.partial(jax.jit, static_argnums=(3, 4))
def flow_loss_weighted(flow_input, flow_recon, iteration, boundaries, values):
    """Fused schedule(iteration) * |flow_input - flow_recon|.mean(dim=1, keepdim=True).

    flow_input / flow_recon: (B, 2, M, H, W) with M = 2*(T-1) bidirectional steps.
    Returns (B, 1, M, H, W).
    """
    B, C, M, H, W = flow_input.shape
    N = M * H * W
    a = flow_input.reshape(B, C, N)
    b = flow_recon.reshape(B, C, N)

    # Lane-dense block along the flattened time*space axis (multiple of 128,
    # or the full extent if N is not 128-aligned).
    blk = N
    if N % 128 == 0:
        for cand in (2048, 1024, 512, 256, 128):
            if N % cand == 0:
                blk = cand
                break
    grid = (B, N // blk)

    it = jnp.asarray(iteration, jnp.int32).reshape(1)
    kernel = functools.partial(_flow_loss_kernel, tuple(boundaries), tuple(values))

    out = pl.pallas_call(
        kernel,
        out_shape=jax.ShapeDtypeStruct((B, 1, N), flow_input.dtype),
        grid_spec=pltpu.PrefetchScalarGridSpec(
            num_scalar_prefetch=1,               # iteration -> SMEM before the grid
            grid=grid,
            in_specs=[
                pl.BlockSpec((1, C, blk), lambda i, j, it_ref: (i, 0, j)),
                pl.BlockSpec((1, C, blk), lambda i, j, it_ref: (i, 0, j)),
            ],
            out_specs=pl.BlockSpec((1, 1, blk), lambda i, j, it_ref: (i, 0, j)),
        ),
        compiler_params=pltpu.CompilerParams(
            dimension_semantics=("parallel", "parallel")),
    )(it, a, b)
    return out.reshape(B, 1, M, H, W)


def schedule_py(iteration, boundaries, values):
    """Pure-python WeightScheduler.forward (host-side gate only; the on-chip
    copy lives inside the fused kernel)."""
    for bd, val in zip(boundaries, values):
        if iteration < bd:
            return val
    return values[-1]


class FlowLoss:
    """JAX/Pallas port of the FlowLoss forward pass.

    The RAFT flow model and the trilinear resampling are untranslated (see
    TODO(synk) at the top); callers pass the two bidirectional flow fields,
    layout (B, 2, 2*(T-1), H, W), in place of `_bidirectional_flow(...)`.
    """
    # TODO(synk): the ndim==4 / T==1 early-exit operates on the raw video input
    # upstream of the (untranslated) flow model and is omitted here.

    def __init__(self, enabled=None):
        self.boundaries = tuple(CONFIG_FLOW['boundaries'])
        self.values = tuple(CONFIG_FLOW['values'])
        self.enabled = CONFIG_FLOW['enabled'] if enabled is None else enabled

    def schedule(self, iteration):
        return schedule_py(iteration, self.boundaries, self.values)

    def __call__(self, flow_input, flow_recon, iteration):
        if not self.enabled or self.schedule(iteration) == 0.0:
            return dict()
        flow = flow_loss_weighted(flow_input, flow_recon, iteration,
                                  self.boundaries, self.values)
        if bool(jnp.isnan(flow).any()):
            raise ValueError('[FLOW] NaN detected in loss')
        return dict(flow=flow)


def _reference(flow_input, flow_recon, iteration, boundaries, values):
    w = schedule_py(iteration, boundaries, values)
    return w * jnp.mean(jnp.abs(flow_input - flow_recon), axis=1, keepdims=True)


if __name__ == "__main__":
    boundaries = CONFIG_FLOW['boundaries']
    values = CONFIG_FLOW['values']

    # flows: (B, 2, 2*(T-1), H, W) with B=2, T=5, H=W=16
    B, C, M, H, W = 2, 2, 8, 16, 16
    key = jax.random.PRNGKey(0)
    k1, k2 = jax.random.split(key)
    flow_in = jax.random.normal(k1, (B, C, M, H, W), jnp.float32)
    flow_rec = flow_in + 0.1 * jax.random.normal(k2, (B, C, M, H, W), jnp.float32)

    ok = True

    # fused kernel vs. pure-JAX reference on both sides of the schedule boundary
    for it in (123, 249999, 250000, 300000):
        got = jax.block_until_ready(
            flow_loss_weighted(flow_in, flow_rec, it, boundaries, values))
        want = _reference(flow_in, flow_rec, it, boundaries, values)
        if got.shape != (B, 1, M, H, W) or not jnp.allclose(got, want, atol=1e-6, rtol=1e-6):
            ok = False
            print(f"MISMATCH iteration={it} "
                  f"max_err={float(jnp.max(jnp.abs(got - want)))}")

    # schedule edge cases through the fused kernel: |a-b| == 1 everywhere, so
    # every output element equals the scheduled weight exactly.
    ones = jnp.ones((1, C, M, H, W), jnp.float32)
    zeros = jnp.zeros((1, C, M, H, W), jnp.float32)
    for it in (0, 1, 249999, 250000, 250001, 10**9):
        got = jax.block_until_ready(
            flow_loss_weighted(ones, zeros, it, boundaries, values))
        want_w = schedule_py(it, boundaries, values)
        if abs(float(got[0, 0, 0, 0, 0]) - want_w) > 1e-7:
            ok = False
            print(f"SCHEDULE MISMATCH iteration={it} "
                  f"got={float(got[0, 0, 0, 0, 0])} want={want_w}")

    # module-level gating semantics
    if FlowLoss()(flow_in, flow_rec, 300000) != dict():            # enabled=False in config
        ok = False
        print("GATE MISMATCH: disabled loss should return an empty dict")
    if FlowLoss(enabled=True)(flow_in, flow_rec, 100) != dict():   # scheduled weight == 0.0
        ok = False
        print("GATE MISMATCH: zero-weight schedule should return an empty dict")
    res = FlowLoss(enabled=True)(flow_in, flow_rec, 300000)
    if set(res.keys()) != {"flow"} or res["flow"].shape != (B, 1, M, H, W):
        ok = False
        print("GATE MISMATCH: enabled loss should return dict(flow=...)")

    if ok:
        print("KERNEL_OK")
</pallas_src>

<mosaic_0001>
module attributes {stable_mosaic.version = 11 : i64} {
  func.func @_flow_loss_kernel(%arg0: i32, %arg1: i32, %arg2: memref<1xi32, #tpu.memory_space<smem>>, %arg3: memref<1x2x2048xf32, #tpu.memory_space<vmem>>, %arg4: memref<1x2x2048xf32, #tpu.memory_space<vmem>>, %arg5: memref<1x1x2048xf32, #tpu.memory_space<vmem>>) attributes {dimension_semantics = [#tpu.dimension_semantics<parallel>, #tpu.dimension_semantics<parallel>], iteration_bounds = array<i64: 2, 1>, scalar_prefetch = 1 : i64, scratch_operands = 0 : i64, tpu.core_type = #tpu.core_type<tc>, window_params = [{transform_indices = @transform_0, window_bounds = array<i64: 1, 2, 2048>}, {transform_indices = @transform_1, window_bounds = array<i64: 1, 2, 2048>}, {transform_indices = @transform_2, window_bounds = array<i64: 1, 1, 2048>}]} {
    %c0 = arith.constant 0 : index
    %0 = memref.load %arg2[%c0] : memref<1xi32, #tpu.memory_space<smem>>
    %c250000_i32 = arith.constant 250000 : i32
    %1 = arith.cmpi slt, %0, %c250000_i32 : i32
    %cst = arith.constant 0.000000e+00 : f32
    %cst_0 = arith.constant 0.00999999977 : f32
    %2 = arith.select %1, %cst, %cst_0 : f32
    %c0_1 = arith.constant 0 : index
    %c0_2 = arith.constant 0 : index
    %c0_3 = arith.constant 0 : index
    %3 = vector.load %arg3[%c0_1, %c0_2, %c0_3] : memref<1x2x2048xf32, #tpu.memory_space<vmem>>, vector<1x2x2048xf32>
    %c0_4 = arith.constant 0 : index
    %c0_5 = arith.constant 0 : index
    %c0_6 = arith.constant 0 : index
    %4 = vector.load %arg4[%c0_4, %c0_5, %c0_6] : memref<1x2x2048xf32, #tpu.memory_space<vmem>>, vector<1x2x2048xf32>
    %5 = arith.subf %3, %4 : vector<1x2x2048xf32>
    %6 = math.absf %5 : vector<1x2x2048xf32>
    %cst_7 = arith.constant dense<0.000000e+00> : vector<1x2048xf32>
    %7 = vector.multi_reduction <add>, %6, %cst_7 [1] : vector<1x2x2048xf32> to vector<1x2048xf32>
    %8 = vector.shape_cast %7 : vector<1x2048xf32> to vector<1x1x2048xf32>
    %cst_8 = arith.constant 2.000000e+00 : f32
    %9 = vector.broadcast %cst_8 : f32 to vector<1x1x2048xf32>
    %10 = arith.divf %8, %9 : vector<1x1x2048xf32>
    %11 = vector.broadcast %2 : f32 to vector<1x1x2048xf32>
    %12 = arith.mulf %11, %10 : vector<1x1x2048xf32>
    %c0_9 = arith.constant 0 : index
    %c0_10 = arith.constant 0 : index
    %c0_11 = arith.constant 0 : index
    %13 = vector.load %arg5[%c0_9, %c0_10, %c0_11] : memref<1x1x2048xf32, #tpu.memory_space<vmem>>, vector<1x1x2048xf32>
    tpu.vector_store %arg5[%c0_9, %c0_10, %c0_11], %12 {strides = array<i32>} : memref<1x1x2048xf32, #tpu.memory_space<vmem>>, vector<1x1x2048xf32>,
    return
  }
  func.func @transform_0(%arg0: i32, %arg1: i32, %arg2: memref<1xi32, #tpu.memory_space<smem>>) -> (i32, i32, i32) {
    %c0_i32 = arith.constant 0 : i32
    %c0_i32_0 = arith.constant 0 : i32
    return %arg0, %c0_i32, %arg1 : i32, i32, i32
  }
  func.func @transform_1(%arg0: i32, %arg1: i32, %arg2: memref<1xi32, #tpu.memory_space<smem>>) -> (i32, i32, i32) {
    %c0_i32 = arith.constant 0 : i32
    %c0_i32_0 = arith.constant 0 : i32
    return %arg0, %c0_i32, %arg1 : i32, i32, i32
  }
  func.func @transform_2(%arg0: i32, %arg1: i32, %arg2: memref<1xi32, #tpu.memory_space<smem>>) -> (i32, i32, i32) {
    %c0_i32 = arith.constant 0 : i32
    %c0_i32_0 = arith.constant 0 : i32
    return %arg0, %c0_i32, %arg1 : i32, i32, i32
  }
}

</mosaic_0001>

<bundles_post_ra>
// kernel: flow_loss_weighted.1
= control target key start
LH: loop header
LB: loop body
LE: loop exit
PB: predicated region body
PF: predicated region fallthrough
CT: control target
= control target key end

     0   :  { %s779_s14 = smov 0   ;;  %s781_s15 = smov 0   ;;  %s899_s0 = inlined_call_operand.<no memory space> [shape: s32[1], index: 0, kind: input, shape index: {}]   ;;  %s900_s1 = inlined_call_operand.vmem [shape: f32[2,2,2048], index: 1, kind: input, shape index: {}]   ;;  %s901_s2 = inlined_call_operand.vmem [shape: f32[2,2,2048], index: 2, kind: input, shape index: {}]   ;;  %s902_s3 = inlined_call_operand.vmem [shape: f32[2,1,2048], index: 3, kind: output, shape index: {}]  }
   0x1   :  { %8 = sst [smem:[#allocation3]] %s899_s0  ;;  %s783_s16 = smov 0  }
   0x2 LB: > { %s26_s0 = sadd.s32 1, %s748_s15  ;;  %p694_p0 = scmp.ge.s32.totalorder %s752_s16, 1  ;;  %s752_s16 = sphi %s783_s16, %s14_s16   ;;  %s748_s15 = sphi %s781_s15, %s904_s15   ;;  %s744_s14 = sphi %s779_s14, %s903_s14  }
   0x3   : > { %p28_p1 = scmp.ge.s32.totalorder %s26_s0, 2  ;;  %p152_p2 = scmp.lt.s32.totalorder %s752_s16, 3 }
   0x5   : > { %s906_s0 = smov (%p28_p1, %s26_s0), 0  ;;  %p153_p3 = pnand %p694_p0, %p152_p2 }
   0x6   : > { %p191_p4 = scmp.lt.s32.totalorder (!%p153_p3), %s744_s14, 1  ;;  %s219_s17 = sld [smem:[#allocation3]] (!%p153_p3)  ;;  %v246_v0 = vlaneseq (!%p153_p3)  ;;  %v754_v1 = vmov (!%p153_p3), 1983009808   ;;  %v755_v3 = vmov (!%p153_p3), 1966171168  }
   0x7   : > { %156 = sbr.rel (%p153_p3) target bundleno = 76 (0x4c), region = 28  ;;  %v244_v2 = vunpack.c.l.s4 (!%p153_p3), %v754_v1  ;;  %v494_v4 = vunpack.c.l.s4 (!%p153_p3), %v755_v3  ;;  %vm326_vm0 = vcmask (!%p153_p3), 1041408  }
   0x8   : > { %v247_v6 = vshrl.u32 (!%p153_p3), %v246_v0, 7 }
   0x9   : > { %v245_v5 = vunpack.c.0.s8 (!%p153_p3), %v244_v2  ;;  %v495_v13 = vunpack.c.0.s8 (!%p153_p3), %v494_v4 }
   0xb   : > { %v248_v18 = vsub.s32 (!%p153_p3), %v245_v5, %v247_v6  ;;  %v808_v26 = vsub.s32 (!%p153_p3), %v495_v13, %v247_v6 }
   0xc   : > { %p220_p5 = scmp.lt.s32.totalorder (!%p153_p3), %s219_s17, 250000 }
   0xe   : > { %s908_s14 = smov (!%p191_p4, %s744_s14), 1 }
   0xf   : > { %s702_s18 = sshll.u32 %s908_s14, 5  ;;  %s699_s26 = sshll.u32 %s908_s14, 4 }
  0x10   : > { %s198_s21 = scalar_lea.vmem %s900_s1, %s702_s18  ;;  %s208_s24 = scalar_lea.vmem %s901_s2, %s702_s18 }
  0x11   : > { %v222_v7 = vld [vmem:[%s198_s21] sm:$0xff]  ;;  %v223_v8 = vld [vmem:[%s198_s21 + $0x8] sm:$0xff]  ;;  %v224_v9 = vld [vmem:[%s198_s21 + $0x10] sm:$0xff]  ;;  %s221_s25 = scalar_select %p220_p5, 0.0, 0.01 }
  0x12   : > { %v225_v10 = vld [vmem:[%s198_s21 + $0x18] sm:$0xff]  ;;  %v226_v11 = vld [vmem:[%s208_s24] sm:$0xff]  ;;  %v227_v12 = vld [vmem:[%s208_s24 + $0x8] sm:$0xff]  ;;  %s217_s29 = scalar_lea.vmem %s902_s3, %s699_s26 }
  0x13   : > { %v228_v14 = vld [vmem:[%s208_s24 + $0x10] sm:$0xff]  ;;  %v229_v15 = vld [vmem:[%s208_s24 + $0x18] sm:$0xff]  ;;  %v230_v16 = vsub.f32 %v222_v7, %v226_v11  ;;  %v231_v17 = vsub.f32 %v223_v8, %v227_v12  ;;  %v806_v25 = vstv %s221_s25 }
  0x14   : > { %v232_v19 = vsub.f32 %v224_v9, %v228_v14  ;;  %v233_v20 = vsub.f32 %v225_v10, %v229_v15 }
  0x15   : > { %v234_v21 = vand.u32 2147483647, %v230_v16  ;;  %v235_v22 = vand.u32 2147483647, %v231_v17 }
  0x16   : > { %v236_v23 = vand.u32 2147483647, %v232_v19  ;;  %v237_v24 = vand.u32 2147483647, %v233_v20 }
  0x17   : > { %v242_v27 = vcombine.high %v234_v21, %v234_v21  ;;  %v249_v28 = vrot.slane %v234_v21, %v248_v18  ;;  %v259_v29 = vcombine.high %v235_v22, %v235_v22  ;;  %v266_v30 = vrot.slane %v235_v22, %v248_v18 }
  0x18   : > { %v276_v31 = vcombine.high %v236_v23, %v236_v23  ;;  %v810_v32 = vrot.slane %v236_v23, %v248_v18  ;;  %v293_v33 = vcombine.high %v237_v24, %v237_v24  ;;  %v812_v34 = vrot.slane %v237_v24, %v248_v18 }
  0x19   : > { %v256_v35 = vrot.slane %v242_v27, %v248_v18  ;;  %v257_v36 = vcombine.high %v249_v28, %v249_v28  ;;  %v273_v37 = vrot.slane %v259_v29, %v248_v18  ;;  %v274_v38 = vcombine.high %v266_v30, %v266_v30 }
  0x1a   : > { %v814_v39 = vrot.slane %v276_v31, %v248_v18  ;;  %v291_v40 = vcombine.high %v810_v32, %v810_v32  ;;  %v818_v41 = vrot.slane %v293_v33, %v248_v18  ;;  %v308_v42 = vcombine.high %v812_v34, %v812_v34 }
  0x1b   : > { %v258_v43 = vcombine.high %v256_v35, %v256_v35  ;;  %v275_v44 = vcombine.high %v273_v37, %v273_v37  ;;  %v327_v45 = vsel %vm326_vm0, %v249_v28, 0.0  ;;  %v334_v46 = vsel %vm326_vm0, %v257_v36, 0.0 }
  0x1c   : > { %v292_v47 = vcombine.high %v814_v39, %v814_v39  ;;  %v309_v48 = vcombine.high %v818_v41, %v818_v41  ;;  %v328_v49 = vrot.slane %v327_v45, 4  ;;  %v335_v50 = vrot.slane %v334_v46, 4 }
  0x1d   : > { %v341_v51 = vsel %vm326_vm0, %v256_v35, 0.0  ;;  %v348_v52 = vsel %vm326_vm0, %v258_v43, 0.0  ;;  %v355_v53 = vsel %vm326_vm0, %v266_v30, 0.0  ;;  %v362_v54 = vsel %vm326_vm0, %v274_v38, 0.0 }
  0x1e   : > { %v329_v55 = vadd.f32 %v328_v49, %v327_v45  ;;  %v336_v56 = vadd.f32 %v335_v50, %v334_v46  ;;  %v342_v57 = vrot.slane %v341_v51, 4  ;;  %v349_v58 = vrot.slane %v348_v52, 4 }
  0x1f   : > { %v356_v59 = vrot.slane %v355_v53, 4  ;;  %v363_v60 = vrot.slane %v362_v54, 4  ;;  %v369_v61 = vsel %vm326_vm0, %v273_v37, 0.0  ;;  %v376_v62 = vsel %vm326_vm0, %v275_v44, 0.0 }
  0x20   : > { %v330_v63 = vrot.slane %v329_v55, 2  ;;  %v337_v0 = vrot.slane %v336_v56, 2  ;;  %v343_v1 = vadd.f32 %v342_v57, %v341_v51  ;;  %v350_v2 = vadd.f32 %v349_v58, %v348_v52 }
  0x21   : > { %v357_v3 = vadd.f32 %v356_v59, %v355_v53  ;;  %v364_v4 = vadd.f32 %v363_v60, %v362_v54  ;;  %v370_v5 = vrot.slane %v369_v61, 4  ;;  %v377_v6 = vrot.slane %v376_v62, 4 }
  0x22   : > { %v331_v7 = vadd.f32 %v330_v63, %v329_v55  ;;  %v338_v8 = vadd.f32 %v337_v0, %v336_v56  ;;  %v344_v9 = vrot.slane %v343_v1, 2  ;;  %v351_v10 = vrot.slane %v350_v2, 2 }
  0x23   : > { %v358_v11 = vrot.slane %v357_v3, 2  ;;  %v365_v12 = vrot.slane %v364_v4, 2  ;;  %v371_v13 = vadd.f32 %v370_v5, %v369_v61  ;;  %v378_v14 = vadd.f32 %v377_v6, %v376_v62 }
  0x24   : > { %v332_v15 = vrot.slane %v331_v7, 1  ;;  %v339_v16 = vrot.slane %v338_v8, 1  ;;  %v345_v17 = vadd.f32 %v344_v9, %v343_v1  ;;  %v352_v18 = vadd.f32 %v351_v10, %v350_v2 }
  0x25   : > { %v359_v19 = vadd.f32 %v358_v11, %v357_v3  ;;  %v366_v20 = vadd.f32 %v365_v12, %v364_v4  ;;  %v372_v21 = vrot.slane %v371_v13, 2  ;;  %v379_v22 = vrot.slane %v378_v14, 2 }
  0x26   : > { %v834_v23 = vadd.f32 %v332_v15, %v331_v7  ;;  %v836_v24 = vadd.f32 %v339_v16, %v338_v8  ;;  %v346_v27 = vrot.slane %v345_v17, 1  ;;  %v353_v28 = vrot.slane %v352_v18, 1 }
  0x27   : > { %v360_v29 = vrot.slane %v359_v19, 1  ;;  %v367_v30 = vrot.slane %v366_v20, 1  ;;  %v373_v31 = vadd.f32 %v372_v21, %v371_v13  ;;  %v380_v33 = vadd.f32 %v379_v22, %v378_v14 }
  0x28   : > { %v347_v35 = vadd.f32 %v346_v27, %v345_v17  ;;  %v354_v36 = vadd.f32 %v353_v28, %v352_v18  ;;  %v383_v37 = vsel %vm326_vm0, %v810_v32, 0.0  ;;  %v390_v38 = vsel %vm326_vm0, %v291_v40, 0.0 }
  0x29   : > { %v361_v43 = vadd.f32 %v360_v29, %v359_v19  ;;  %v368_v44 = vadd.f32 %v367_v30, %v366_v20  ;;  %v374_v45 = vrot.slane %v373_v31, 1  ;;  %v381_v46 = vrot.slane %v380_v33, 1 }
  0x2a   : > { %v384_v49 = vrot.slane %v383_v37, 4  ;;  %v391_v50 = vrot.slane %v390_v38, 4  ;;  %v397_v51 = vsel %vm326_vm0, %v814_v39, 0.0  ;;  %v404_v52 = vsel %vm326_vm0, %v292_v47, 0.0 }
  0x2b   : > { %v375_v53 = vadd.f32 %v374_v45, %v373_v31  ;;  %v382_v54 = vadd.f32 %v381_v46, %v380_v33  ;;  %v398_v55 = vrot.slane %v397_v51, 4  ;;  %v405_v56 = vrot.slane %v404_v52, 4 }
  0x2c   : > { %v385_v57 = vadd.f32 %v384_v49, %v383_v37  ;;  %v392_v58 = vadd.f32 %v391_v50, %v390_v38  ;;  %v411_v32 = vsel %vm326_vm0, %v812_v34, 0.0  ;;  %v418_v40 = vsel %vm326_vm0, %v308_v42, 0.0 }
  0x2d   : > { %v399_v59 = vadd.f32 %v398_v55, %v397_v51  ;;  %v406_v60 = vadd.f32 %v405_v56, %v404_v52  ;;  %v412_v61 = vrot.slane %v411_v32, 4  ;;  %v419_v39 = vrot.slane %v418_v40, 4 }
  0x2e   : > { %v386_v62 = vrot.slane %v385_v57, 2  ;;  %v393_v47 = vrot.slane %v392_v58, 2  ;;  %v425_v63 = vsel %vm326_vm0, %v818_v41, 0.0  ;;  %v432_v0 = vsel %vm326_vm0, %v309_v48, 0.0 }
  0x2f   : > { %v400_v1 = vrot.slane %v399_v59, 2  ;;  %v407_v2 = vrot.slane %v406_v60, 2  ;;  %v413_v3 = vadd.f32 %v412_v61, %v411_v32  ;;  %v420_v34 = vadd.f32 %v419_v39, %v418_v40 }
  0x30   : > { %v387_v4 = vadd.f32 %v386_v62, %v385_v57  ;;  %v394_v42 = vadd.f32 %v393_v47, %v392_v58  ;;  %v426_v5 = vrot.slane %v425_v63, 4  ;;  %v433_v6 = vrot.slane %v432_v0, 4 }
  0x31   : > { %v401_v7 = vadd.f32 %v400_v1, %v399_v59  ;;  %v408_v8 = vadd.f32 %v407_v2, %v406_v60  ;;  %v414_v9 = vrot.slane %v413_v3, 2  ;;  %v421_v10 = vrot.slane %v420_v34, 2 }
  0x32   : > { %v388_v11 = vrot.slane %v387_v4, 1  ;;  %v395_v12 = vrot.slane %v394_v42, 1  ;;  %v427_v13 = vadd.f32 %v426_v5, %v425_v63  ;;  %v434_v14 = vadd.f32 %v433_v6, %v432_v0 }
  0x33   : > { %v402_v15 = vrot.slane %v401_v7, 1  ;;  %v409_v41 = vrot.slane %v408_v8, 1  ;;  %v415_v16 = vadd.f32 %v414_v9, %v413_v3  ;;  %v422_v48 = vadd.f32 %v421_v10, %v420_v34 }
  0x34   : > { %v389_v17 = vadd.f32 %v388_v11, %v387_v4  ;;  %v396_v18 = vadd.f32 %v395_v12, %v394_v42  ;;  %v428_v19 = vrot.slane %v427_v13, 2  ;;  %v435_v20 = vrot.slane %v434_v14, 2 }
  0x35   : > { %v403_v21 = vadd.f32 %v402_v15, %v401_v7  ;;  %v410_v22 = vadd.f32 %v409_v41, %v408_v8  ;;  %v416_v27 = vrot.slane %v415_v16, 1  ;;  %v423_v28 = vrot.slane %v422_v48, 1 }
  0x36   : > { %v429_v29 = vadd.f32 %v428_v19, %v427_v13  ;;  %v436_v30 = vadd.f32 %v435_v20, %v434_v14  ;;  %v440_v31 = vmul.f32 0.5, %v834_v23  ;;  %v441_v33 = vmul.f32 0.5, %v836_v24 }
  0x37   : > { %v417_v37 = vadd.f32 %v416_v27, %v415_v16  ;;  %v424_v38 = vadd.f32 %v423_v28, %v422_v48  ;;  %v442_v45 = vmul.f32 0.5, %v347_v35  ;;  %v443_v46 = vmul.f32 0.5, %v354_v36 }
  0x38   : > { %v430_v49 = vrot.slane %v429_v29, 1  ;;  %v437_v50 = vrot.slane %v436_v30, 1  ;;  %v444_v51 = vmul.f32 0.5, %v361_v43  ;;  %v445_v52 = vmul.f32 0.5, %v368_v44 }
  0x39   : > { %v446_v55 = vmul.f32 0.5, %v375_v53  ;;  %v447_v56 = vmul.f32 0.5, %v382_v54  ;;  %v448_v57 = vmul.f32 0.5, %v389_v17  ;;  %v449_v58 = vmul.f32 0.5, %v396_v18 }
  0x3a   : > { %v431_v32 = vadd.f32 %v430_v49, %v429_v29  ;;  %v438_v40 = vadd.f32 %v437_v50, %v436_v30  ;;  %v450_v59 = vmul.f32 0.5, %v403_v21  ;;  %v451_v60 = vmul.f32 0.5, %v410_v22 }
  0x3b   : > { %v452_v61 = vmul.f32 0.5, %v417_v37  ;;  %v453_v23 = vmul.f32 0.5, %v424_v38  ;;  %v457_v24 = vmul.f32 %v806_v25, %v440_v31  ;;  %v458_v39 = vmul.f32 %v806_v25, %v441_v33 }
  0x3c   : > { %v454_v35 = vmul.f32 0.5, %v431_v32  ;;  %v455_v36 = vmul.f32 0.5, %v438_v40  ;;  %v459_v62 = vmul.f32 %v806_v25, %v442_v45  ;;  %v460_v43 = vmul.f32 %v806_v25, %v443_v46 }
  0x3d   : > { %v461_v44 = vmul.f32 %v806_v25, %v444_v51  ;;  %v462_v53 = vmul.f32 %v806_v25, %v445_v52  ;;  %v463_v54 = vmul.f32 %v806_v25, %v446_v55  ;;  %v464_v47 = vmul.f32 %v806_v25, %v447_v56 }
  0x3e   : > { %v465_v63 = vmul.f32 %v806_v25, %v448_v57  ;;  %v466_v0 = vmul.f32 %v806_v25, %v449_v58  ;;  %v467_v1 = vmul.f32 %v806_v25, %v450_v59  ;;  %v468_v2 = vmul.f32 %v806_v25, %v451_v60 }
  0x3f   : > { %v469_v3 = vmul.f32 %v806_v25, %v452_v61  ;;  %v470_v34 = vmul.f32 %v806_v25, %v453_v23  ;;  %v471_v4 = vmul.f32 %v806_v25, %v454_v35  ;;  %v472_v42 = vmul.f32 %v806_v25, %v455_v36 }
  0x40   : > { %v489_v5 = vcombine.low %v457_v24, %v458_v39  ;;  %v490_v6 = vcombine.low %v459_v62, %v460_v43  ;;  %v491_v7 = vcombine.low %v461_v44, %v462_v53  ;;  %v492_v8 = vcombine.low %v463_v54, %v464_v47 }
  0x41   : > { %v538_v9 = vcombine.low %v465_v63, %v466_v0  ;;  %v539_v10 = vcombine.low %v467_v1, %v468_v2  ;;  %v540_v11 = vcombine.low %v469_v3, %v470_v34  ;;  %v541_v12 = vcombine.low %v471_v4, %v472_v42 }
  0x42   : > { %v499_v13 = vrot.slane %v489_v5, %v808_v26  ;;  %v506_v14 = vrot.slane %v490_v6, %v808_v26  ;;  %v513_v15 = vrot.slane %v491_v7, %v808_v26  ;;  %v520_v41 = vrot.slane %v492_v8, %v808_v26 }
  0x43   : > { %v548_v16 = vrot.slane %v538_v9, %v808_v26  ;;  %v555_v25 = vrot.slane %v539_v10, %v808_v26  ;;  %v562_v48 = vrot.slane %v540_v11, %v808_v26  ;;  %v569_v17 = vrot.slane %v541_v12, %v808_v26 }
  0x44   : > { %v521_v18 = vcombine.low %v499_v13, %v506_v14  ;;  %v522_v19 = vcombine.low %v513_v15, %v520_v41 }
  0x45   : > { %v570_v20 = vcombine.low %v548_v16, %v555_v25  ;;  %v571_v21 = vcombine.low %v562_v48, %v569_v17 }
  0x46   : > { %v529_v22 = vrot.slane %v521_v18, %v808_v26  ;;  %v536_v27 = vrot.slane %v522_v19, %v808_v26 }
  0x47   : > { %v578_v28 = vrot.slane %v570_v20, %v808_v26  ;;  %v585_v29 = vrot.slane %v571_v21, %v808_v26 }
  0x48   : > { %v537_v30 = vcombine.low %v529_v22, %v536_v27 }
  0x49   : > { %v586_v31 = vcombine.low %v578_v28, %v585_v29 }
  0x4a   : > { %589 = vst [vmem:[%s217_s29] sm:$0xff] %v537_v30 }
  0x4b   : > { %590 = vst [vmem:[%s217_s29 + $0x8] sm:$0xff] %v586_v31 }
  0x4c PF: > { %s14_s16 = sadd.s32 1, %s752_s16   ;;  %s903_s14 = smov %s748_s15 }
  0x4d   : > { %p11_p6 = scmp.ge.s32.totalorder %s14_s16, 4   ;;  %s904_s15 = smov %s906_s0 }
  0x4f   :  { %13 = sbr.rel (!%p11_p6) target bundleno = 2 (0x2), region = 61 }

</bundles_post_ra>
